<compile_context>
chip_gen: v6e
topology: v6e:2x2x1
jax: 0.10.0
libtpu: 0.0.40
codegen_flags: <defaults>
</compile_context>

<pallas_src>
import functools

import jax
import jax.numpy as jnp
import numpy as np
from jax.experimental import pallas as pl
from jax.experimental.pallas import tpu as pltpu


# ----------------------------- Pallas kernels ------------------------------

def _bridge_kernel(x_ref, wt_ref, b_ref, o_ref):
    # y = x @ Wt + b    (Wt pre-transposed, output lanes pre-padded to 128)
    acc = jnp.dot(x_ref[...], wt_ref[...], preferred_element_type=jnp.float32)
    o_ref[...] = (acc + b_ref[...]).astype(o_ref.dtype)


def _fused_step_kernel(x_ref, wt1_ref, b1_ref, wt2_ref, dec_ref, log_ref):
    # decoded = x @ W_e2e^T + b     (stays in vregs)
    # logits  = decoded @ embed_matrix^T   (lane-dense V=128 output)
    dec = jnp.dot(x_ref[...], wt1_ref[...],
                  preferred_element_type=jnp.float32) + b1_ref[...]
    dec_ref[...] = dec.astype(dec_ref.dtype)
    log_ref[...] = jnp.dot(dec, wt2_ref[...],
                           preferred_element_type=jnp.float32).astype(log_ref.dtype)


def _matmul_kernel(x_ref, wt_ref, o_ref):
    # y = x @ wt  (standalone embedding_to_logits, single block)
    o_ref[...] = jnp.dot(x_ref[...], wt_ref[...],
                         preferred_element_type=jnp.float32).astype(o_ref.dtype)


def _pad_rows(x2d):
    m = x2d.shape[0]
    mp = max(8, ((m + 7) // 8) * 8)
    if mp != m:
        x2d = jnp.pad(x2d, ((0, mp - m), (0, 0)))
    return x2d, m, mp


# ------------------------------ jitted wrappers -----------------------------

@functools.partial(jax.jit, static_argnames=("n_out",))
def pallas_bridge(x2d, wt_pad, b_pad, *, n_out):
    """x2d: (M, K) f32; wt_pad: (K, Npad) pre-transposed & lane-padded;
    b_pad: (1, Npad). Returns (M, n_out)."""
    xp, m, mp = _pad_rows(x2d.astype(jnp.float32))
    k = xp.shape[1]
    npad = wt_pad.shape[1]
    out = pl.pallas_call(
        _bridge_kernel,
        out_shape=jax.ShapeDtypeStruct((mp, npad), jnp.float32),
        grid=(1,),
        in_specs=[
            pl.BlockSpec((mp, k), lambda i: (0, 0)),
            pl.BlockSpec((k, npad), lambda i: (0, 0)),
            pl.BlockSpec((1, npad), lambda i: (0, 0)),
        ],
        out_specs=pl.BlockSpec((mp, npad), lambda i: (0, 0)),
        compiler_params=pltpu.CompilerParams(
            dimension_semantics=("arbitrary",)),
    )(xp, wt_pad, b_pad)
    return out[:m, :n_out]


@jax.jit
def pallas_step_fused(x2d, wt1, b1, wt2):
    """Fused per-step decode path.
    x2d: (B, transformer_dim); wt1: (transformer_dim, E); b1: (1, E);
    wt2: (E, V).  Returns (decoded (B, E), logits (B, V))."""
    xp, m, mp = _pad_rows(x2d.astype(jnp.float32))
    k = xp.shape[1]
    e = wt1.shape[1]
    v = wt2.shape[1]
    decoded, logits = pl.pallas_call(
        _fused_step_kernel,
        out_shape=(jax.ShapeDtypeStruct((mp, e), jnp.float32),
                   jax.ShapeDtypeStruct((mp, v), jnp.float32)),
        grid=(1,),
        in_specs=[
            pl.BlockSpec((mp, k), lambda i: (0, 0)),
            pl.BlockSpec((k, e), lambda i: (0, 0)),
            pl.BlockSpec((1, e), lambda i: (0, 0)),
            pl.BlockSpec((e, v), lambda i: (0, 0)),
        ],
        out_specs=(pl.BlockSpec((mp, e), lambda i: (0, 0)),
                   pl.BlockSpec((mp, v), lambda i: (0, 0))),
        compiler_params=pltpu.CompilerParams(
            dimension_semantics=("arbitrary",)),
    )(xp, wt1, b1, wt2)
    return decoded[:m], logits[:m]


@jax.jit
def embedding_to_logits_pallas(embedding, embed_matrix_t):
    """Faithful Pallas version of the module-level `embedding_to_logits`.
    embedding: (T, B, E) or (B, E); embed_matrix_t: (E, V) pre-transposed.
    Returns (T, B, V, 1) (T==1 prepended for 2-D input)."""
    emb = embedding.astype(jnp.float32)
    lead = ((1,) + emb.shape[:-1]) if emb.ndim == 2 else emb.shape[:-1]
    e = emb.shape[-1]
    v = embed_matrix_t.shape[1]
    xp, m, mp = _pad_rows(emb.reshape(-1, e))
    out = pl.pallas_call(
        _matmul_kernel,
        out_shape=jax.ShapeDtypeStruct((mp, v), jnp.float32),
        grid=(1,),
        in_specs=[
            pl.BlockSpec((mp, e), lambda i: (0, 0)),
            pl.BlockSpec((e, v), lambda i: (0, 0)),
        ],
        out_specs=pl.BlockSpec((mp, v), lambda i: (0, 0)),
        compiler_params=pltpu.CompilerParams(
            dimension_semantics=("arbitrary",)),
    )(xp, embed_matrix_t)
    return out[:m].reshape(lead + (v, 1))


# --------------------------- BeamDecoder (JAX) -----------------------------

class BeamDecoderPallas:
    """Self-contained re-implementation of BeamDecoder's computable forward
    pieces, with the dense math in Pallas kernels and weights pre-transposed /
    lane-padded once at construction."""

    LANE = 128

    def __init__(self, key, *, vocab=128, word_embed_dim=32, lm_dim=32,
                 enc_feature=512, max_decode_len=8):
        self.vocab = vocab
        self.word_embed_dim = word_embed_dim
        self.lm_dim = lm_dim
        self.transformer_dim = word_embed_dim + lm_dim
        self.enc_feature = enc_feature
        self.max_decode_len = max_decode_len

        k1, k2, k3, k4, k5 = jax.random.split(key, 5)
        # word_embedding.weight  (vocab, word_embed_dim)
        self.embed_matrix = 0.02 * jax.random.normal(
            k1, (vocab, word_embed_dim), dtype=jnp.float32)
        # enc_to_dec_bridge = nn.Linear(512, transformer_dim)  (PyTorch (N, K))
        self.W_enc = jax.random.normal(
            k2, (self.transformer_dim, enc_feature),
            dtype=jnp.float32) / np.sqrt(enc_feature)
        self.b_enc = 0.01 * jax.random.normal(
            k3, (self.transformer_dim,), dtype=jnp.float32)
        # dec_to_embed_bridge = nn.Linear(transformer_dim, word_embed_dim)
        self.W_e2e = jax.random.normal(
            k4, (word_embed_dim, self.transformer_dim),
            dtype=jnp.float32) / np.sqrt(self.transformer_dim)
        self.b_e2e = 0.01 * jax.random.normal(
            k5, (word_embed_dim,), dtype=jnp.float32)

        # ---- one-time kernel-ready parameter prep (pre-transposed, f32) ----
        n_enc = self.transformer_dim
        n_pad = max(self.LANE, ((n_enc + self.LANE - 1) // self.LANE) * self.LANE)
        wt_enc = jnp.transpose(self.W_enc).astype(jnp.float32)        # (512, 64)
        self.Wt_enc_pad = jnp.zeros((enc_feature, n_pad), jnp.float32
                                    ).at[:, :n_enc].set(wt_enc)       # (512, 128)
        self.b_enc_pad = jnp.zeros((1, n_pad), jnp.float32
                                   ).at[0, :n_enc].set(self.b_enc)    # (1, 128)
        self.Wt_e2e = jnp.transpose(self.W_e2e).astype(jnp.float32)   # (64, 32)
        self.b_e2e_row = self.b_e2e.reshape(1, -1).astype(jnp.float32)  # (1, 32)
        self.Et = jnp.transpose(self.embed_matrix).astype(jnp.float32)  # (32, 128)

    def forward_setup(self, encoder_output, encoder_padding, target_ids):
        """Everything the reference forward() executes before it raises
        NotImplementedError (teacher-forcing branch)."""
        T, B, F = encoder_output.shape
        L = target_ids.shape[1]

        # word_embedding(input_ids) -> (B, L, E) -> permute(1, 0, 2)
        tokens_embed = jnp.take(self.embed_matrix, target_ids, axis=0)
        tokens_embed = jnp.transpose(tokens_embed, (1, 0, 2))          # (L, B, E)

        # causal target mask (True = masked), as in the reference
        tgt_mask = ~jnp.tril(jnp.ones((L, L), dtype=bool))

        all_logits = jnp.zeros((L, B, self.vocab), dtype=encoder_output.dtype)
        built_seq = jnp.zeros((L, B, self.transformer_dim),
                              dtype=encoder_output.dtype)
        built_seq = built_seq.at[0, :, :self.word_embed_dim].set(tokens_embed[0])

        # memory_converted = enc_to_dec_bridge(encoder_output)  (Pallas matmul)
        mem = pallas_bridge(encoder_output.reshape(T * B, F),
                            self.Wt_enc_pad, self.b_enc_pad,
                            n_out=self.transformer_dim)
        memory_converted = mem.reshape(T, B, self.transformer_dim)

        # TODO(synk): the reference raises NotImplementedError("Beam search
        # hasn't been implemented yet.") at this point; the decode loop below
        # would need nn.TransformerDecoder + the GPT-2 LanguageModel.
        return all_logits, built_seq, tgt_mask, tokens_embed, memory_converted

    def step_logits(self, trans_out_i):
        """Per-step hot path of the (unreachable) decode loop, fused into ONE
        Pallas kernel:
           decoded = dec_to_embed_bridge(trans_out[i])
           logits  = embedding_to_logits(decoded, embed_matrix).squeeze(-1).squeeze(0)
        trans_out_i: (B, transformer_dim) -> (decoded (B, E), logits (B, V))."""
        return pallas_step_fused(trans_out_i, self.Wt_e2e,
                                 self.b_e2e_row, self.Et)


# ---------------------------------- main -----------------------------------

if __name__ == "__main__":
    key = jax.random.PRNGKey(0)
    k_mod, k_enc, k_ids = jax.random.split(key, 3)

    # small shapes consistent with the module
    T, B, F = 8, 2, 512          # encoder: time x batch x feature (512 hard-coded bridge)
    L = 8                        # max_target_len

    dec = BeamDecoderPallas(k_mod, vocab=128, word_embed_dim=32, lm_dim=32,
                            enc_feature=F, max_decode_len=L)

    encoder_output = jax.random.normal(k_enc, (T, B, F), dtype=jnp.float32)
    encoder_padding = jnp.zeros((B, T), dtype=bool)
    target_ids = jax.random.randint(k_ids, (B, L), 0, dec.vocab)

    (all_logits, built_seq, tgt_mask, tokens_embed,
     memory_converted) = dec.forward_setup(encoder_output, encoder_padding,
                                           target_ids)

    # stand-in for trans_out[i] (true value would come from the TransformerDecoder)
    trans_out_i = memory_converted[1]                      # (B, transformer_dim)
    decoded, logits = dec.step_logits(trans_out_i)

    # standalone embedding_to_logits (faithful (T,B,V,1) shape, module-level fn)
    logits4 = embedding_to_logits_pallas(decoded, dec.Et)  # (1, B, V, 1)

    jax.block_until_ready((memory_converted, built_seq, decoded, logits, logits4))

    # ---- reference checks (plain jnp) ----
    mem_ref = encoder_output @ dec.W_enc.T + dec.b_enc
    dec_ref = trans_out_i @ dec.W_e2e.T + dec.b_e2e
    log_ref = dec_ref @ dec.embed_matrix.T

    assert memory_converted.shape == (T, B, dec.transformer_dim)
    assert built_seq.shape == (L, B, dec.transformer_dim)
    assert all_logits.shape == (L, B, dec.vocab)
    assert tgt_mask.shape == (L, L)
    assert decoded.shape == (B, dec.word_embed_dim)
    assert logits.shape == (B, dec.vocab)
    assert logits4.shape == (1, B, dec.vocab, 1)
    np.testing.assert_allclose(np.asarray(memory_converted), np.asarray(mem_ref),
                               rtol=1e-4, atol=1e-4)
    np.testing.assert_allclose(np.asarray(decoded), np.asarray(dec_ref),
                               rtol=1e-4, atol=1e-4)
    np.testing.assert_allclose(np.asarray(logits), np.asarray(log_ref),
                               rtol=1e-4, atol=1e-4)
    np.testing.assert_allclose(np.asarray(logits4[0, :, :, 0]),
                               np.asarray(logits), rtol=1e-5, atol=1e-5)
    np.testing.assert_allclose(np.asarray(built_seq[0, :, :dec.word_embed_dim]),
                               np.asarray(tokens_embed[0]), rtol=0, atol=0)

    print("KERNEL_OK")
</pallas_src>

<mosaic_0001>
module attributes {stable_mosaic.version = 11 : i64} {
  func.func @_bridge_kernel(%arg0: i32, %arg1: memref<16x512xf32, #tpu.memory_space<vmem>>, %arg2: memref<512x128xf32, #tpu.memory_space<vmem>>, %arg3: memref<1x128xf32, #tpu.memory_space<vmem>>, %arg4: memref<16x128xf32, #tpu.memory_space<vmem>>) attributes {dimension_semantics = [#tpu.dimension_semantics<arbitrary>], iteration_bounds = array<i64: 1>, scalar_prefetch = 0 : i64, scratch_operands = 0 : i64, tpu.core_type = #tpu.core_type<tc>, window_params = [{pipeline_mode = #tpu.pipeline_mode<synchronous>, transform_indices = @transform_0, window_bounds = array<i64: 16, 512>}, {pipeline_mode = #tpu.pipeline_mode<synchronous>, transform_indices = @transform_1, window_bounds = array<i64: 512, 128>}, {pipeline_mode = #tpu.pipeline_mode<synchronous>, transform_indices = @transform_2, window_bounds = array<i64: 1, 128>}, {pipeline_mode = #tpu.pipeline_mode<synchronous>, transform_indices = @transform_3, window_bounds = array<i64: 16, 128>}]} {
    %c0 = arith.constant 0 : index
    %c0_0 = arith.constant 0 : index
    %0 = vector.load %arg1[%c0, %c0_0] : memref<16x512xf32, #tpu.memory_space<vmem>>, vector<16x512xf32>
    %c0_1 = arith.constant 0 : index
    %c0_2 = arith.constant 0 : index
    %1 = vector.load %arg2[%c0_1, %c0_2] : memref<512x128xf32, #tpu.memory_space<vmem>>, vector<512x128xf32>
    %cst = arith.constant dense<0.000000e+00> : vector<16x128xf32>
    %2 = tpu.matmul %0, %1, %cst {dimension_numbers = #tpu.dot_dimension_numbers<[1], [0], [0], [1], [0, 0, 1, 1], [], []>} : vector<16x512xf32>, vector<512x128xf32>, vector<16x128xf32> -> vector<16x128xf32>
    %c0_3 = arith.constant 0 : index
    %c0_4 = arith.constant 0 : index
    %3 = vector.load %arg3[%c0_3, %c0_4] : memref<1x128xf32, #tpu.memory_space<vmem>>, vector<1x128xf32>
    %4 = vector.broadcast %3 : vector<1x128xf32> to vector<16x128xf32>
    %5 = arith.addf %2, %4 : vector<16x128xf32>
    %c0_5 = arith.constant 0 : index
    %c0_6 = arith.constant 0 : index
    %6 = vector.load %arg4[%c0_5, %c0_6] : memref<16x128xf32, #tpu.memory_space<vmem>>, vector<16x128xf32>
    tpu.vector_store %arg4[%c0_5, %c0_6], %5 {strides = array<i32>} : memref<16x128xf32, #tpu.memory_space<vmem>>, vector<16x128xf32>,
    return
  }
  func.func @transform_0(%arg0: i32) -> (i32, i32) {
    %c0_i32 = arith.constant 0 : i32
    %c0_i32_0 = arith.constant 0 : i32
    %c0_i32_1 = arith.constant 0 : i32
    return %c0_i32, %c0_i32_0 : i32, i32
  }
  func.func @transform_1(%arg0: i32) -> (i32, i32) {
    %c0_i32 = arith.constant 0 : i32
    %c0_i32_0 = arith.constant 0 : i32
    %c0_i32_1 = arith.constant 0 : i32
    return %c0_i32, %c0_i32_0 : i32, i32
  }
  func.func @transform_2(%arg0: i32) -> (i32, i32) {
    %c0_i32 = arith.constant 0 : i32
    %c0_i32_0 = arith.constant 0 : i32
    %c0_i32_1 = arith.constant 0 : i32
    return %c0_i32, %c0_i32_0 : i32, i32
  }
  func.func @transform_3(%arg0: i32) -> (i32, i32) {
    %c0_i32 = arith.constant 0 : i32
    %c0_i32_0 = arith.constant 0 : i32
    %c0_i32_1 = arith.constant 0 : i32
    return %c0_i32, %c0_i32_0 : i32, i32
  }
}

</mosaic_0001>

<bundles_post_ra>
// kernel: pallas_bridge.1
= control target key start
LH: loop header
LB: loop body
LE: loop exit
PB: predicated region body
PF: predicated region fallthrough
CT: control target
= control target key end

     0   :  { %8 = vsyncpa [#allocation3], 0  ;;  %s487_s0 = inlined_call_operand.hbm [shape: f32[16,512], index: 0, kind: input, shape index: {}]   ;;  %s488_s1 = inlined_call_operand.hbm [shape: f32[512,128], index: 1, kind: input, shape index: {}]   ;;  %s489_s2 = inlined_call_operand.vmem [shape: f32[1,128], index: 2, kind: input, shape index: {}]   ;;  %s490_s3 = inlined_call_operand.hbm [shape: f32[16,128], index: 3, kind: output, shape index: {}]  }
   0x1   :  { %9 = vsyncpa [#allocation6], 0 }
   0x2   :  { %10 = vsyncpa [#allocation4], 0  ;;  %s442_s12 = smov [#allocation2]  }
   0x3   :  { %s16_s13 = sshll.u32 %s442_s12, 4  ;;  %s17_s13 = int_to_ptr.vmem [resolvable:$true] %s16_s13 }
   0x4   :  { %s384_s14 = scalar_lea.vmem %s17_s13, 1024  ;;  %p389_p1 = scmp.lt.s32.totalorder %s17_s13, %s17_s13 }
   0x5   :  { %p385_p0 = scmp.ne.s32.totalorder %s17_s13, %s384_s14  ;;  %p390_p2 = scmp.lt.s32.totalorder %s384_s14, %s384_s14 }
   0x7   :  { %p391_p3 = por %p390_p2, %p389_p1 }
   0x9   :  { %p392_p4 = pnand %p391_p3, %p385_p0 }
   0xb   :  { %395 = shalt.err (!%p392_p4)
}
   0xc   :  { %s443_s15 = smov 512   ;;  %s444_s16 = smov 32  }
   0xd   :  { %22 = dma.hbm_to_vmem [thread:$0]  %s487_s0, 1024, %s17_s13, [#allocation3], %s443_s15, %s443_s15, %s444_s16  }
   0xe   :  { %s445_s19 = smov [#allocation5]  }
   0xf   :  { %s28_s20 = sshll.u32 %s445_s19, 4  ;;  %s29_s20 = int_to_ptr.vmem [resolvable:$true] %s28_s20 }
  0x10   :  { %s404_s21 = scalar_lea.vmem %s29_s20, 8192  ;;  %p409_p6 = scmp.lt.s32.totalorder %s29_s20, %s29_s20 }
  0x11   :  { %p405_p5 = scmp.ne.s32.totalorder %s29_s20, %s404_s21  ;;  %p410_p7 = scmp.lt.s32.totalorder %s404_s21, %s404_s21 }
  0x13   :  { %p411_p8 = por %p410_p7, %p409_p6 }
  0x15   :  { %p412_p9 = pnand %p411_p8, %p405_p5 }
  0x17   :  { %415 = shalt.err (!%p412_p9)
}
  0x18   :  { %s446_s22 = smov 128   ;;  %s447_s23 = smov 8  }
  0x19   :  { %34 = dma.hbm_to_vmem [thread:$0]  %s488_s1, 8192, %s29_s20, [#allocation6], %s446_s22, %s446_s22, %s447_s23  }
  0x1a   :  { %436 = dma.done.wait [#allocation3], 1024  }
  0x1b   :  { %437 = vsyncadd [#allocation3], 4294966272 }
  0x1c   :  { %438 = dma.done.wait [#allocation6], 8192  }
  0x1d   :  { %439 = vsyncadd [#allocation6], 4294959104  ;;  %v82_v0 = vld [vmem:[#allocation5 + $0xf8] sm:$0xff]  ;;  %v81_v4 = vld [vmem:[#allocation5 + $0xf0] sm:$0xff]  ;;  %s448_s26 = smov [#allocation7]  }
  0x1e   :  { %v114_v1 = vld [vmem:[#allocation5 + $0x1f8] sm:$0xff]  ;;  %293 = vmatprep.subr.mxu0 %v82_v0  ;;  %v113_v5 = vld [vmem:[#allocation5 + $0x1f0] sm:$0xff]  ;;  %v80_v8 = vld [vmem:[#allocation5 + $0xe8] sm:$0xff]  ;;  %s279_s27 = sshll.u32 %s448_s26, 4  ;;  %s280_s27 = int_to_ptr.vmem [resolvable:$true] %s279_s27 }
  0x1f   :  { %v66_v2 = vld [vmem:[#allocation5 + $0x78] sm:$0xff]  ;;  %331 = vmatprep.subr.mxu1 %v114_v1  ;;  %v65_v6 = vld [vmem:[#allocation5 + $0x70] sm:$0xff]  ;;  %v112_v9 = vld [vmem:[#allocation5 + $0x1e8] sm:$0xff]  ;;  %p421_p11 = scmp.lt.s32.totalorder %s280_s27, %s280_s27 }
  0x20   :  { %v98_v3 = vld [vmem:[#allocation5 + $0x178] sm:$0xff]  ;;  %294 = vmatpush3.msra.mxu0 %v66_v2  ;;  %v97_v7 = vld [vmem:[#allocation5 + $0x170] sm:$0xff]  ;;  %v64_v10 = vld [vmem:[#allocation5 + $0x68] sm:$0xff] }
  0x21   :  { %332 = vmatpush3.msra.mxu1 %v98_v3  ;;  %295 = vmatprep.subr.mxu0 %v81_v4  ;;  %v96_v11 = vld [vmem:[#allocation5 + $0x168] sm:$0xff]  ;;  %v79_v12 = vld [vmem:[#allocation5 + $0xe0] sm:$0xff]  ;;  %v78_v16 = vld [vmem:[#allocation5 + $0xd8] sm:$0xff] }
  0x22   :  { %333 = vmatprep.subr.mxu1 %v113_v5  ;;  %296 = vmatpush3.msra.mxu0 %v65_v6  ;;  %v111_v13 = vld [vmem:[#allocation5 + $0x1e0] sm:$0xff]  ;;  %v110_v17 = vld [vmem:[#allocation5 + $0x1d8] sm:$0xff]  ;;  %v77_v20 = vld [vmem:[#allocation5 + $0xd0] sm:$0xff] }
  0x23   :  { %334 = vmatpush3.msra.mxu1 %v97_v7  ;;  %297 = vmatprep.subr.mxu0 %v80_v8  ;;  %v63_v14 = vld [vmem:[#allocation5 + $0x60] sm:$0xff]  ;;  %v62_v18 = vld [vmem:[#allocation5 + $0x58] sm:$0xff]  ;;  %v109_v21 = vld [vmem:[#allocation5 + $0x1d0] sm:$0xff] }
  0x24   :  { %335 = vmatprep.subr.mxu1 %v112_v9  ;;  %v95_v15 = vld [vmem:[#allocation5 + $0x160] sm:$0xff]  ;;  %298 = vmatpush3.msra.mxu0 %v64_v10  ;;  %v94_v19 = vld [vmem:[#allocation5 + $0x158] sm:$0xff]  ;;  %v61_v22 = vld [vmem:[#allocation5 + $0x50] sm:$0xff] }
  0x25   :  { %336 = vmatpush3.msra.mxu1 %v96_v11  ;;  %299 = vmatprep.subr.mxu0 %v79_v12  ;;  %v93_v23 = vld [vmem:[#allocation5 + $0x150] sm:$0xff]  ;;  %v76_v24 = vld [vmem:[#allocation5 + $0xc8] sm:$0xff]  ;;  %v75_v28 = vld [vmem:[#allocation5 + $0xc0] sm:$0xff] }
  0x26   :  { %337 = vmatprep.subr.mxu1 %v111_v13  ;;  %300 = vmatpush3.msra.mxu0 %v63_v14  ;;  %v108_v25 = vld [vmem:[#allocation5 + $0x1c8] sm:$0xff]  ;;  %v107_v29 = vld [vmem:[#allocation5 + $0x1c0] sm:$0xff]  ;;  %v74_v32 = vld [vmem:[#allocation5 + $0xb8] sm:$0xff] }
  0x27   :  { %338 = vmatpush3.msra.mxu1 %v95_v15  ;;  %301 = vmatprep.subr.mxu0 %v78_v16  ;;  %v60_v26 = vld [vmem:[#allocation5 + $0x48] sm:$0xff]  ;;  %v59_v30 = vld [vmem:[#allocation5 + $0x40] sm:$0xff]  ;;  %v106_v33 = vld [vmem:[#allocation5 + $0x1b8] sm:$0xff] }
  0x28   :  { %339 = vmatprep.subr.mxu1 %v110_v17  ;;  %302 = vmatpush3.msra.mxu0 %v62_v18  ;;  %v92_v27 = vld [vmem:[#allocation5 + $0x148] sm:$0xff]  ;;  %v91_v31 = vld [vmem:[#allocation5 + $0x140] sm:$0xff]  ;;  %v58_v34 = vld [vmem:[#allocation5 + $0x38] sm:$0xff] }
  0x29   :  { %340 = vmatpush3.msra.mxu1 %v94_v19  ;;  %303 = vmatprep.subr.mxu0 %v77_v20  ;;  %v90_v35 = vld [vmem:[#allocation5 + $0x138] sm:$0xff]  ;;  %v73_v36 = vld [vmem:[#allocation5 + $0xb0] sm:$0xff]  ;;  %v72_v40 = vld [vmem:[#allocation5 + $0xa8] sm:$0xff] }
  0x2a   :  { %341 = vmatprep.subr.mxu1 %v109_v21  ;;  %304 = vmatpush3.msra.mxu0 %v61_v22  ;;  %v105_v37 = vld [vmem:[#allocation5 + $0x1b0] sm:$0xff]  ;;  %v104_v41 = vld [vmem:[#allocation5 + $0x1a8] sm:$0xff]  ;;  %v71_v44 = vld [vmem:[#allocation5 + $0xa0] sm:$0xff] }
  0x2b   :  { %342 = vmatpush3.msra.mxu1 %v93_v23  ;;  %305 = vmatprep.subr.mxu0 %v76_v24  ;;  %v57_v38 = vld [vmem:[#allocation5 + $0x30] sm:$0xff]  ;;  %v56_v42 = vld [vmem:[#allocation5 + $0x28] sm:$0xff]  ;;  %v103_v45 = vld [vmem:[#allocation5 + $0x1a0] sm:$0xff] }
  0x2c   :  { %343 = vmatprep.subr.mxu1 %v108_v25  ;;  %306 = vmatpush3.msra.mxu0 %v60_v26  ;;  %v89_v39 = vld [vmem:[#allocation5 + $0x130] sm:$0xff]  ;;  %v88_v43 = vld [vmem:[#allocation5 + $0x128] sm:$0xff]  ;;  %v55_v46 = vld [vmem:[#allocation5 + $0x20] sm:$0xff] }
  0x2d   :  { %344 = vmatpush3.msra.mxu1 %v92_v27  ;;  %307 = vmatprep.subr.mxu0 %v75_v28  ;;  %v87_v47 = vld [vmem:[#allocation5 + $0x120] sm:$0xff]  ;;  %v70_v48 = vld [vmem:[#allocation5 + $0x98] sm:$0xff]  ;;  %v69_v52 = vld [vmem:[#allocation5 + $0x90] sm:$0xff] }
  0x2e   :  { %345 = vmatprep.subr.mxu1 %v107_v29  ;;  %308 = vmatpush3.msra.mxu0 %v59_v30  ;;  %v102_v49 = vld [vmem:[#allocation5 + $0x198] sm:$0xff]  ;;  %v101_v53 = vld [vmem:[#allocation5 + $0x190] sm:$0xff]  ;;  %v68_v56 = vld [vmem:[#allocation5 + $0x88] sm:$0xff] }
  0x2f   :  { %346 = vmatpush3.msra.mxu1 %v91_v31  ;;  %309 = vmatprep.subr.mxu0 %v74_v32  ;;  %v54_v50 = vld [vmem:[#allocation5 + $0x18] sm:$0xff]  ;;  %v53_v54 = vld [vmem:[#allocation5 + $0x10] sm:$0xff]  ;;  %v100_v57 = vld [vmem:[#allocation5 + $0x188] sm:$0xff] }
  0x30   :  { %347 = vmatprep.subr.mxu1 %v106_v33  ;;  %310 = vmatpush3.msra.mxu0 %v58_v34  ;;  %v86_v51 = vld [vmem:[#allocation5 + $0x118] sm:$0xff]  ;;  %v85_v55 = vld [vmem:[#allocation5 + $0x110] sm:$0xff]  ;;  %v52_v58 = vld [vmem:[#allocation5 + $0x8] sm:$0xff] }
  0x31   :  { %348 = vmatpush3.msra.mxu1 %v90_v35  ;;  %311 = vmatprep.subr.mxu0 %v73_v36  ;;  %v84_v59 = vld [vmem:[#allocation5 + $0x108] sm:$0xff]  ;;  %v67_v60 = vld [vmem:[#allocation5 + $0x80] sm:$0xff]  ;;  %v46_v1 = vld [vmem:[#allocation2 + $0x18] sm:$0xff] }
  0x32   :  { %349 = vmatprep.subr.mxu1 %v105_v37  ;;  %312 = vmatpush3.msra.mxu0 %v57_v38  ;;  %v99_v61 = vld [vmem:[#allocation5 + $0x180] sm:$0xff]  ;;  %v44_v63 = vld [vmem:[#allocation2 + $0x8] sm:$0xff]  ;;  %v45_v3 = vld [vmem:[#allocation2 + $0x10] sm:$0xff] }
  0x33   :  { %350 = vmatpush3.msra.mxu1 %v89_v39  ;;  %313 = vmatprep.subr.mxu0 %v72_v40  ;;  %v51_v62 = vld [vmem:[#allocation5] sm:$0xff]  ;;  %v48_v4 = vld [vmem:[#allocation2 + $0x28] sm:$0xff]  ;;  %v50_v5 = vld [vmem:[#allocation2 + $0x38] sm:$0xff] }
  0x34   :  { %351 = vmatprep.subr.mxu1 %v104_v41  ;;  %314 = vmatpush3.msra.mxu0 %v56_v42  ;;  %v83_v0 = vld [vmem:[#allocation5 + $0x100] sm:$0xff]  ;;  %v49_v7 = vld [vmem:[#allocation2 + $0x30] sm:$0xff] }
  0x35   :  { %352 = vmatpush3.msra.mxu1 %v88_v43  ;;  %315 = vmatprep.subr.mxu0 %v71_v44  ;;  %v43_v2 = vld [vmem:[#allocation2] sm:$0xff] }
  0x36   :  { %353 = vmatprep.subr.mxu1 %v103_v45  ;;  %316 = vmatpush3.msra.mxu0 %v55_v46  ;;  %v47_v6 = vld [vmem:[#allocation2 + $0x20] sm:$0xff] }
  0x37   :  { %354 = vmatpush3.msra.mxu1 %v87_v47  ;;  %317 = vmatprep.subr.mxu0 %v70_v48  ;;  %v292_v10 = vld [vmem:[%s489_s2] ss:$0 sm:$0xff]  ;;  %s416_s2 = scalar_lea.vmem %s280_s27, 256 }
  0x38   :  { %355 = vmatprep.subr.mxu1 %v102_v49  ;;  %318 = vmatpush3.msra.mxu0 %v54_v50  ;;  %p417_p10 = scmp.ne.s32.totalorder %s280_s27, %s416_s2  ;;  %p422_p12 = scmp.lt.s32.totalorder %s416_s2, %s416_s2 }
  0x39   :  { %356 = vmatpush3.msra.mxu1 %v86_v51  ;;  %319 = vmatprep.subr.mxu0 %v69_v52 }
  0x3a   :  { %357 = vmatprep.subr.mxu1 %v101_v53  ;;  %320 = vmatpush3.msra.mxu0 %v53_v54  ;;  %p423_p13 = por %p422_p12, %p421_p11 }
  0x3b   :  { %358 = vmatpush3.msra.mxu1 %v85_v55  ;;  %321 = vmatprep.subr.mxu0 %v68_v56 }
  0x3c   :  { %359 = vmatprep.subr.mxu1 %v100_v57  ;;  %322 = vmatpush3.msra.mxu0 %v52_v58  ;;  %p424_p0 = pnand %p423_p13, %p417_p10 }
  0x3d   :  { %360 = vmatpush3.msra.mxu1 %v84_v59  ;;  %323 = vmatprep.subr.mxu0 %v67_v60 }
  0x3e   :  { %361 = vmatprep.subr.mxu1 %v99_v61  ;;  %324 = vmatpush3.msra.mxu0 %v51_v62 }
  0x3f   :  { %186 = vmatprep.mubr.f32.mxu0 %v44_v63  ;;  %362 = vmatpush3.msra.mxu1 %v83_v0 }
  0x40   :  { %261 = vmatprep.mubr.f32.mxu1 %v46_v1  ;;  %187 = vmatmul.mubr.f32.vlgmr.msra.gmra.mxu0 %v43_v2 }
  0x41   :  { %262 = vmatmul.mubr.f32.vlgmr.msra.gmra.mxu1 %v45_v3  ;;  %191 = vmatprep.mubr.f32.mxu0 %v48_v4 }
  0x42   :  { %266 = vmatprep.mubr.f32.mxu1 %v50_v5 }
  0x44   :  { %192 = vmatmul.mubr.f32.gmra.mxu0 %v47_v6 }
  0x45   :  { %267 = vmatmul.mubr.f32.gmra.mxu1 %v49_v7 }
 0x100   :  { %v325_v8 = vpop.f32.mrf.mxu0 }
 0x101   :  { %v363_v9 = vpop.f32.mrf.mxu1 }
 0x102   :  { %v326_v11 = vpop.f32.mrf.mxu0 }
 0x103   :  { %v364_v12 = vpop.f32.mrf.mxu1  ;;  %v327_v13 = vadd.f32 %v326_v11, %v325_v8 }
 0x104   :  { %v328_v14 = vpop.f32.mrf.mxu0  ;;  %v365_v17 = vadd.f32 %v364_v12, %v363_v9 }
 0x105   :  { %v366_v15 = vpop.f32.mrf.mxu1  ;;  %v189_v16 = vadd.f32 %v327_v13, %v292_v10 }
 0x106   :  { %v329_v18 = vpop.f32.mrf.mxu0 }
 0x107   :  { %v367_v19 = vpop.f32.mrf.mxu1  ;;  %v264_v20 = vadd.f32 %v365_v17, %v189_v16  ;;  %v330_v21 = vadd.f32 %v329_v18, %v328_v14 }
 0x108   :  { %v368_v23 = vadd.f32 %v367_v19, %v366_v15 }
 0x109   :  { %272 = vst [vmem:[#allocation7] sm:$0xff] %v264_v20  ;;  %v194_v22 = vadd.f32 %v330_v21, %v292_v10 }
 0x10b   :  { %v269_v24 = vadd.f32 %v368_v23, %v194_v22 }
 0x10d   :  { %273 = vst [vmem:[#allocation7 + $0x8] sm:$0xff] %v269_v24 }
 0x10e   :  { %427 = shalt.err (!%p424_p0)
}
 0x10f   :  { %285 = dma.vmem_to_hbm [thread:$0]  %s280_s27, 256, %s490_s3, [#allocation4], %s446_s22, %s446_s22, %s447_s23  }
 0x110   :  { %440 = dma.done.wait [#allocation4], 256  }
 0x111   :  { %441 = vsyncadd [#allocation4], 4294967040 }
 0x112   :  { %289 = vsyncpa [#allocation3], 1 }
 0x113   :  { %290 = vsyncpa [#allocation6], 1 }
 0x114   :  { %291 = vsyncpa [#allocation4], 1 }

</bundles_post_ra>
